<compile_context>
chip_gen: v5e
topology: v5e:2x2
jax: 0.10.0
libtpu: 0.0.40
codegen_flags: <defaults>
</compile_context>

<pallas_src>
import math

import jax
import jax.numpy as jnp
from jax.experimental import pallas as pl
from jax.experimental.pallas import tpu as pltpu


def _make_axial_kernel(num_lead):
    """Kernel for one output slab (one combination of leading axial indices).

    refs = (*lead_refs, penult_ref, last_ref, o_ref)
      lead_refs[k] : (L_k, W)      lane-widened leading table (whole, VMEM);
                                   the row is picked with pl.program_id(k)
      penult_ref   : (L_{N-1}, W)  lane-widened second-to-last table
      last_ref     : (1, W)        last table flattened onto the lane axis
      o_ref        : (L_{N-1}, W)  lane-dense output slab for this grid step
    with W = shape[-1] * dim.
    """

    def kernel(*refs):
        lead_refs = refs[:num_lead]
        penult_ref = refs[num_lead]
        last_ref = refs[num_lead + 1]
        o_ref = refs[num_lead + 2]

        # Prefix over the leading axes: one (1, W) row per grid step,
        # accumulated left-to-right exactly like the PyTorch forward loop.
        if num_lead > 0:
            acc = lead_refs[0][pl.ds(pl.program_id(0), 1), :]
            for k in range(1, num_lead):
                acc = acc + lead_refs[k][pl.ds(pl.program_id(k), 1), :]
            acc = acc + penult_ref[...]      # (L_{N-1}, W) sublane broadcast
        else:
            acc = penult_ref[...]

        # out[r, j*dim + c] = sum_k lead_k[i_k, c] + penult[r, c] + last[j, c]
        o_ref[...] = acc + last_ref[...]     # (1, W) sublane broadcast + dense store

    return kernel


class AxialPositionalEmbedding:
    """JAX/Pallas port of nuwa_pytorch.AxialPositionalEmbedding (forward only)."""

    def __init__(self, dim, *, shape, key):
        shape = tuple(filter(lambda t: t > 1, shape))
        if len(shape) == 0:
            raise ValueError(
                "AxialPositionalEmbedding requires at least one axis with "
                f"length > 1 (got filtered shape={shape!r})."
            )
        self.dim = dim
        self.shape = shape
        self.num_axials = len(shape)

        # Deterministic "randn" init for each axial parameter (axial_len, dim).
        keys = jax.random.split(key, self.num_axials)
        self.axials = [
            jax.random.normal(k, (axial_len, dim), dtype=jnp.float32)
            for k, axial_len in zip(keys, shape)
        ]

        # Build the pallas_call + jitted forward exactly once.
        if self.num_axials >= 2:
            self._positions_2d = jax.jit(self._build_positions_2d())

    # ------------------------------------------------------------------ #
    def _build_positions_2d(self):
        dim = self.dim
        shape = self.shape

        lead_shape = shape[:-2]              # grid axes (may be empty)
        num_lead = len(lead_shape)
        l_penult = shape[-2]                 # rows (sublanes) of each output slab
        l_last = shape[-1]                   # folded into the lane axis
        lane_w = l_last * dim                # lane-dense output width
        num_rows = math.prod(shape[:-1])     # total rows of the 2-D output

        kernel = _make_axial_kernel(num_lead)

        grid = lead_shape if num_lead > 0 else (1,)

        def const0(*_):
            return (0, 0)

        if num_lead > 0:
            def out_index_map(*gs):
                flat = gs[0]
                for g, l in zip(gs[1:], lead_shape[1:]):
                    flat = flat * l + g      # row-major flatten of leading axes
                return (flat, 0)
        else:
            out_index_map = const0

        # Tiny parameter tables: whole-array blocks with a constant index_map,
        # so they are fetched into VMEM once and stay resident.
        in_specs = (
            [pl.BlockSpec((l, lane_w), const0) for l in lead_shape]
            + [pl.BlockSpec((l_penult, lane_w), const0),
               pl.BlockSpec((1, lane_w), const0)]
        )
        # NOTE: typical NUWA shapes (powers of two) give an (8,128)-aligned
        # output block; for odd shapes Mosaic falls back to masked stores.
        out_spec = pl.BlockSpec((l_penult, lane_w), out_index_map)

        # VMEM budget: output slab is double-buffered; inputs are residents.
        out_block_bytes = l_penult * lane_w * 4
        in_bytes = (sum(lead_shape) + l_penult + 1) * lane_w * 4
        vmem_needed = 2 * out_block_bytes + 2 * in_bytes + (2 << 20)
        vmem_limit = int(vmem_needed) if vmem_needed > (16 << 20) else None

        pallas_fn = pl.pallas_call(
            kernel,
            out_shape=jax.ShapeDtypeStruct((num_rows, lane_w), jnp.float32),
            grid=grid,
            in_specs=in_specs,
            out_specs=out_spec,
            compiler_params=pltpu.CompilerParams(
                # Disjoint output slabs per step -> parallel (megacore on v7x;
                # harmless no-op on single-TC v5e/v6e).
                dimension_semantics=("parallel",) * len(grid),
                vmem_limit_bytes=vmem_limit,
            ),
        )

        def fwd(*axials):
            lead = axials[:num_lead]
            penult = axials[num_lead]
            last = axials[num_lead + 1]
            # Wrapper-side layout plumbing (free vs. the O(prod(shape)*dim)
            # output write): widen the tiny leading / penultimate tables onto
            # the lane axis and flatten the last table to one lane-dense row.
            lead_wide = tuple(jnp.tile(t, (1, l_last)) for t in lead)
            penult_wide = jnp.tile(penult, (1, l_last))
            last_flat = last.reshape(1, lane_w)
            # TODO(synk): optionally emit bf16 output (halves HBM write traffic)
            # if downstream tolerates it; kept f32 to match the reference exactly.
            return pallas_fn(*lead_wide, penult_wide, last_flat)

        return fwd

    # ------------------------------------------------------------------ #
    def __call__(self, *, flatten=True):
        if self.num_axials == 1:
            # positions == axial1, already (L1, dim); flatten is a no-op.
            return self.axials[0]

        pos2d = self._positions_2d(*self.axials)   # (prod(shape[:-1]), L_N*dim)
        if flatten:
            return pos2d.reshape(-1, self.dim)      # '... d -> (...) d'
        return pos2d.reshape(*self.shape, self.dim)

    # Pure-JAX reference (mirrors the PyTorch forward, for checking only).
    def reference(self, *, flatten=True):
        positions = None
        for axial_pos in self.axials:
            if positions is None:
                positions = axial_pos
                continue
            positions = positions[..., None, :] + axial_pos
        if flatten:
            positions = positions.reshape(-1, self.dim)
        return positions


if __name__ == "__main__":
    key = jax.random.PRNGKey(0)

    dim = 32
    # shape filter(>1) keeps all three axes here (e.g. frames=2, h=8, w=8).
    module = AxialPositionalEmbedding(dim, shape=(2, 8, 8), key=key)

    out = module(flatten=True)
    out = jax.block_until_ready(out)
    ref = module.reference(flatten=True)

    assert out.shape == (2 * 8 * 8, dim), out.shape
    assert out.dtype == jnp.float32
    assert jnp.allclose(out, ref, atol=1e-6, rtol=1e-6)

    # Unflattened path too ('... d' layout).
    out_nf = jax.block_until_ready(module(flatten=False))
    ref_nf = module.reference(flatten=False)
    assert out_nf.shape == (2, 8, 8, dim), out_nf.shape
    assert jnp.allclose(out_nf, ref_nf, atol=1e-6, rtol=1e-6)

    print("KERNEL_OK")
</pallas_src>

<mosaic_0001>
module attributes {stable_mosaic.version = 11 : i64} {
  func.func @kernel(%arg0: i32, %arg1: memref<2x256xf32, #tpu.memory_space<vmem>>, %arg2: memref<8x256xf32, #tpu.memory_space<vmem>>, %arg3: memref<1x256xf32, #tpu.memory_space<vmem>>, %arg4: memref<8x256xf32, #tpu.memory_space<vmem>>) attributes {dimension_semantics = [#tpu.dimension_semantics<parallel>], iteration_bounds = array<i64: 2>, scalar_prefetch = 0 : i64, scratch_operands = 0 : i64, tpu.core_type = #tpu.core_type<tc>, window_params = [{pipeline_mode = #tpu.pipeline_mode<synchronous>, transform_indices = @transform_0, window_bounds = array<i64: 2, 256>}, {pipeline_mode = #tpu.pipeline_mode<synchronous>, transform_indices = @transform_1, window_bounds = array<i64: 8, 256>}, {pipeline_mode = #tpu.pipeline_mode<synchronous>, transform_indices = @transform_2, window_bounds = array<i64: 1, 256>}, {transform_indices = @transform_3, window_bounds = array<i64: 8, 256>}]} {
    %0 = arith.index_cast %arg0 : i32 to index
    %c0 = arith.constant 0 : index
    %1 = vector.load %arg1[%0, %c0] : memref<2x256xf32, #tpu.memory_space<vmem>>, vector<1x256xf32>
    %c0_0 = arith.constant 0 : index
    %c0_1 = arith.constant 0 : index
    %2 = vector.load %arg2[%c0_0, %c0_1] : memref<8x256xf32, #tpu.memory_space<vmem>>, vector<8x256xf32>
    %3 = vector.broadcast %1 : vector<1x256xf32> to vector<8x256xf32>
    %4 = arith.addf %3, %2 : vector<8x256xf32>
    %c0_2 = arith.constant 0 : index
    %c0_3 = arith.constant 0 : index
    %5 = vector.load %arg3[%c0_2, %c0_3] : memref<1x256xf32, #tpu.memory_space<vmem>>, vector<1x256xf32>
    %6 = vector.broadcast %5 : vector<1x256xf32> to vector<8x256xf32>
    %7 = arith.addf %4, %6 : vector<8x256xf32>
    %c0_4 = arith.constant 0 : index
    %c0_5 = arith.constant 0 : index
    %8 = vector.load %arg4[%c0_4, %c0_5] : memref<8x256xf32, #tpu.memory_space<vmem>>, vector<8x256xf32>
    tpu.vector_store %arg4[%c0_4, %c0_5], %7 {strides = array<i32>} : memref<8x256xf32, #tpu.memory_space<vmem>>, vector<8x256xf32>,
    return
  }
  func.func @transform_0(%arg0: i32) -> (i32, i32) {
    %c0_i32 = arith.constant 0 : i32
    %c0_i32_0 = arith.constant 0 : i32
    %c0_i32_1 = arith.constant 0 : i32
    return %c0_i32, %c0_i32_0 : i32, i32
  }
  func.func @transform_1(%arg0: i32) -> (i32, i32) {
    %c0_i32 = arith.constant 0 : i32
    %c0_i32_0 = arith.constant 0 : i32
    %c0_i32_1 = arith.constant 0 : i32
    return %c0_i32, %c0_i32_0 : i32, i32
  }
  func.func @transform_2(%arg0: i32) -> (i32, i32) {
    %c0_i32 = arith.constant 0 : i32
    %c0_i32_0 = arith.constant 0 : i32
    %c0_i32_1 = arith.constant 0 : i32
    return %c0_i32, %c0_i32_0 : i32, i32
  }
  func.func @transform_3(%arg0: i32) -> (i32, i32) {
    %c0_i32 = arith.constant 0 : i32
    %c0_i32_0 = arith.constant 0 : i32
    return %arg0, %c0_i32 : i32, i32
  }
}

</mosaic_0001>

<bundles_post_ra>
// kernel: tile.19
= control target key start
LH: loop header
LB: loop body
LE: loop exit
PB: predicated region body
PF: predicated region fallthrough
CT: control target
= control target key end

     0   :  { %vm26_vm0 = vcmask 1047556   ;;  %s111_s14 = smov 96   ;;  %s112_s17 = smov 64   ;;  %vm3_vm1 = vcmask 261120   ;;  %vm30_vm2 = vcmask 1048320   ;;  %vm51_vm3 = vcmask 785920   ;;  %s214_s0 = inlined_call_operand.vmem [shape: f32[8,8,32], index: 0, kind: input, shape index: {}]   ;;  %s215_s1 = inlined_call_operand.vmem [shape: f32[8,256], index: 1, kind: output, shape index: {}]  }
   0x1   :  { %v93_v0 = vld [vmem:[%s214_s0 + $0x3] ss:$8 sm:$0xf]   ;;  %v98_v3 = vld [vmem:[%s214_s0 + $0x2] ss:$8 sm:$0xf]  }
   0x2   :  { %v94_v1 = vld [vmem:[%s214_s0 + $0x3] ss:$8 sm:$0xf0]   ;;  %v99_v4 = vld [vmem:[%s214_s0 + $0x2] ss:$8 sm:$0xf0]  }
   0x3   :  { %v27_v2 = vsel %vm26_vm0, %v94_v1, %v93_v0  ;;  %v48_v5 = vsel %vm26_vm0, %v99_v4, %v98_v3  ;;  %v95_v6 = vld [vmem:[%s214_s0 + $0x7] ss:$8 sm:$0xf]   ;;  %v100_v8 = vld [vmem:[%s214_s0 + $0x6] ss:$8 sm:$0xf]  }
   0x4   :  { %28 = vrot.lane.b32.xlu0 %v27_v2, %s111_s14  ;;  %49 = vrot.lane.b32.xlu1 %v48_v5, %s112_s17  ;;  %v96_v7 = vld [vmem:[%s214_s0 + $0x7] ss:$8 sm:$0xf0]   ;;  %v103_v9 = vld [vmem:[%s214_s0 + $0x1] ss:$8 sm:$0xf]  }
   0x5   :  { %v104_v10 = vld [vmem:[%s214_s0 + $0x1] ss:$8 sm:$0xf0]   ;;  %v101_v11 = vld [vmem:[%s214_s0 + $0x6] ss:$8 sm:$0xf0]   ;;  %v37_v13 = vsel %vm26_vm0, %v96_v7, %v95_v6 }
   0x6   :  { %v69_v12 = vsel %vm26_vm0, %v104_v10, %v103_v9  ;;  %s113_s28 = smov 32   ;;  %v58_v14 = vsel %vm26_vm0, %v101_v11, %v100_v8  ;;  %v105_v15 = vld [vmem:[%s214_s0 + $0x5] ss:$8 sm:$0xf]   ;;  %v2_v18 = vld [vmem:[%s214_s0] ss:$4 sm:$0xff]  }
   0x7   :  { %70 = vrot.lane.b32.xlu2 %v69_v12, %s113_s28  ;;  %v106_v16 = vld [vmem:[%s214_s0 + $0x5] ss:$8 sm:$0xf0]   ;;  %4 = vst.msk [vmem:[%s215_s1] ss:$8 sm:$0x3] %vm3_vm1, %v2_v18  }
   0x8   :  { %v79_v17 = vsel %vm26_vm0, %v106_v16, %v105_v15  ;;  %85 = vst.msk [vmem:[%s215_s1 - $0xf] ss:$8 sm:$0xc] %vm3_vm1, %v2_v18   ;;  %v88_v19 = vld [vmem:[%s214_s0 + $0x20] ss:$4 sm:$0xff]   ;;  %vm72_vm4 = vcmask 523520  }
   0x9   :  { %86 = vst.msk [vmem:[%s215_s1 - $0x1e] ss:$8 sm:$0x30] %vm3_vm1, %v2_v18  }
   0xa   :  { %87 = vst.msk [vmem:[%s215_s1 - $0x2d] ss:$8 sm:$0xc0] %vm3_vm1, %v2_v18  }
   0xb   :  { %89 = vst.msk [vmem:[%s215_s1 + $0x4] ss:$8 sm:$0x3] %vm3_vm1, %v88_v19  }
   0xc   :  { %38 = vrot.lane.b32.xlu0 %v37_v13, %s111_s14  ;;  %59 = vrot.lane.b32.xlu1 %v58_v14, %s112_s17  ;;  %90 = vst.msk [vmem:[%s215_s1 - $0xb] ss:$8 sm:$0xc] %vm3_vm1, %v88_v19  }
   0xd   :  { %91 = vst.msk [vmem:[%s215_s1 - $0x1a] ss:$8 sm:$0x30] %vm3_vm1, %v88_v19  }
   0xe   :  { %92 = vst.msk [vmem:[%s215_s1 - $0x29] ss:$8 sm:$0xc0] %vm3_vm1, %v88_v19  }
   0xf   :  { %80 = vrot.lane.b32.xlu2 %v79_v17, %s113_s28 }
  0x61   :  { %v71_v20 = vpop.permute.xlu2 %70  }
  0x69   :  { %v81_v21 = vpop.permute.xlu2 %80  }
  0x76   :  { %v29_v22 = vpop.permute.xlu0 %28   ;;  %v50_v23 = vpop.permute.xlu1 %49  }
  0x77   :  { %31 = vst.msk [vmem:[%s215_s1] sm:$0xff] %vm30_vm2, %v29_v22  }
  0x78   :  { %52 = vst.msk [vmem:[%s215_s1] sm:$0xff] %vm51_vm3, %v50_v23  }
  0x79   :  { %73 = vst.msk [vmem:[%s215_s1] sm:$0xff] %vm72_vm4, %v71_v20  }
  0x7e   :  { %v39_v24 = vpop.permute.xlu0 %38   ;;  %v60_v25 = vpop.permute.xlu1 %59  }
  0x7f   :  { %97 = vst.msk [vmem:[%s215_s1 + $0x8] sm:$0xff] %vm30_vm2, %v39_v24  }
  0x80   :  { %102 = vst.msk [vmem:[%s215_s1 + $0x8] sm:$0xff] %vm51_vm3, %v60_v25  }
  0x81   :  { %107 = vst.msk [vmem:[%s215_s1 + $0x8] sm:$0xff] %vm72_vm4, %v81_v21  }

// kernel: tile.14
= control target key start
LH: loop header
LB: loop body
LE: loop exit
PB: predicated region body
PF: predicated region fallthrough
CT: control target
= control target key end

     0   :  { %s50_s8 = smov 96   ;;  %s51_s11 = smov 32   ;;  %vm3_vm0 = vcmask 261120   ;;  %vm11_vm1 = vcmask 1048320   ;;  %vm19_vm2 = vcmask 785920   ;;  %vm27_vm3 = vcmask 523520   ;;  %s81_s0 = inlined_call_operand.vmem [shape: f32[2,8,32], index: 0, kind: input, shape index: {}]   ;;  %s82_s1 = inlined_call_operand.vmem [shape: f32[2,256], index: 1, kind: output, shape index: {}]  }
   0x1   :  { %v43_v0 = vld.sshfl [vmem:[%s81_s0 + $0x3] sm:$0xff pattern:$0xccccc480]   ;;  %v45_v1 = vld.sshfl [vmem:[%s81_s0 + $0x1] sm:$0xff pattern:$0xccccc480]  }
   0x2   :  { %9 = vrot.lane.b32.xlu0 %v43_v0, %s50_s8  ;;  %25 = vrot.lane.b32.xlu1 %v45_v1, %s51_s11  ;;  %v44_v2 = vld.sshfl [vmem:[%s81_s0 + $0x2] sm:$0xff pattern:$0xccccc480]   ;;  %s52_s14 = smov 64  }
   0x3   :  { %v2_v3 = vld [vmem:[%s81_s0] ss:$4 sm:$0xf]  }
   0x4   :  { %4 = vst.msk [vmem:[#allocation0] ss:$8 sm:$0x3] %vm3_vm0, %v2_v3  }
   0x5   :  { %6 = vst.msk [vmem:[#allocation0 - $0xf] ss:$8 sm:$0xc] %vm3_vm0, %v2_v3  }
   0xa   :  { %17 = vrot.lane.b32.xlu0 %v44_v2, %s52_s14 }
  0x74   :  { %v10_v4 = vpop.permute.xlu0 %9   ;;  %v26_v5 = vpop.permute.xlu1 %25  }
  0x75   :  { %12 = vst.msk [vmem:[#allocation0] sm:$0x3] %vm11_vm1, %v10_v4  }
  0x76   :  { %14 = vst.msk [vmem:[#allocation0 + $0x6] sm:$0xc] %vm11_vm1, %v10_v4  }
  0x7c   :  { %v18_v6 = vpop.permute.xlu0 %17  }
  0x7d   :  { %20 = vst.msk [vmem:[#allocation0] sm:$0x3] %vm19_vm2, %v18_v6  }
  0x7e   :  { %22 = vst.msk [vmem:[#allocation0 + $0x6] sm:$0xc] %vm19_vm2, %v18_v6  }
  0x7f   :  { %28 = vst.msk [vmem:[#allocation0] sm:$0x3] %vm27_vm3, %v26_v5  }
  0x80   :  { %30 = vst.msk [vmem:[#allocation0 + $0x6] sm:$0xc] %vm27_vm3, %v26_v5  }
  0x86   :  { %v33_v7 = vld [vmem:[#allocation0] sm:$0x3] }
  0x87   :  { %36 = vst [vmem:[%s82_s1] sm:$0x3] %v33_v7  ;;  %v38_v8 = vld [vmem:[#allocation0 + $0x8] sm:$0x3] }
  0x88   :  { %46 = vst [vmem:[%s82_s1 + $0x2] sm:$0x3] %v38_v8 }

// kernel: fwd.1
= control target key start
LH: loop header
LB: loop body
LE: loop exit
PB: predicated region body
PF: predicated region fallthrough
CT: control target
= control target key end

     0   :  { %8 = vsyncpa [#allocation3], 0  ;;  %s474_s0 = inlined_call_operand.vmem [shape: f32[2,256], index: 0, kind: input, shape index: {}]   ;;  %s475_s1 = inlined_call_operand.vmem [shape: f32[8,256], index: 1, kind: input, shape index: {}]   ;;  %s476_s2 = inlined_call_operand.vmem [shape: f32[1,256], index: 2, kind: input, shape index: {}]   ;;  %s477_s3 = inlined_call_operand.hbm [shape: f32[16,256], index: 3, kind: output, shape index: {}]  }
   0x1   :  { %10 = vsyncpa [#allocation3 + $0x1], 0  ;;  %s380_s12 = smov 0   ;;  %s382_s13 = smov 0  }
   0x2   :  { %s384_s14 = smov 0   ;;  %s386_s15 = smov 0  }
   0x3 LB: > { %s401_s16 = sadd.s32 4294967295, %s358_s15   ;;  %s244_s17 = sadd.s32 4294967294, %s358_s15   ;;  %s358_s15 = sphi %s386_s15, %s483_s15   ;;  %s354_s14 = sphi %s384_s14, %s482_s14   ;;  %s350_s13 = sphi %s382_s13, %s481_s13   ;;  %s346_s12 = sphi %s380_s12, %s480_s12  }
   0x4   : > { %s405_s18 = sadd.s32 1, %s358_s15   ;;  %s86_s19 = sadd.s32 1, %s354_s14 }
   0x5   : > { %s83_s20 = ssub.s32 %s358_s15, %s405_s18  ;;  %p96_p0 = scmp.ne.s32.totalorder %s354_s14, %s350_s13 }
   0x6   : > { %p84_p1 = scmp.eq.s32.totalorder %s83_s20, 0  ;;  %p97_p2 = scmp.eq.s32.totalorder %s401_s16, 1 }
   0x7   : > { %p102_p3 = scmp.ne.s32.totalorder %s350_s13, %s346_s12  ;;  %p103_p4 = scmp.eq.s32.totalorder %s244_s17, 1 }
   0x8   : > { %s416_s21 = scalar_select %p84_p1, %s354_s14, %s86_s19  }
   0x9   : > { %p418_p5 = por %p97_p2, %p96_p0  ;;  %p422_p6 = por %p103_p4, %p102_p3 }
   0xa   : > { %p246_p7 = scmp.ge.s32.totalorder %s358_s15, 1  ;;  %p130_p8 = scmp.lt.s32.totalorder %s358_s15, 3 }
   0xc   : > { %p131_p9 = pnand %p246_p7, %p130_p8 }
   0xd   : > { %s146_s24 = sand.u32 (!%p131_p9), 1, %s350_s13   ;;  %s149_s25 = sshra.s32 (!%p131_p9), %s401_s16, 1 }
   0xe   : > { %134 = sbr.rel (%p131_p9) target bundleno = 32 (0x20), region = 32  ;;  %s152_s26 = sand.u32 (!%p131_p9), 1, %s401_s16 }
   0xf   : > { %s247_s27 = sshll.u32 (!%p131_p9), %s146_s24, 4  ;;  %s255_s28 = sshll.u32 (!%p131_p9), %s149_s25, 2 }
  0x10   : > { %s155_s29 = sadd.s32 (!%p131_p9), %s255_s28, %s152_s26  ;;  %s256_s17 = sshll.u32 (!%p131_p9), %s401_s16, 4 }
  0x11   : > { %s156_s7 = scalar_lea.vmem (!%p131_p9), %s474_s0, %s155_s29  ;;  %s189_s25 = scalar_lea.hbm (!%p131_p9), %s477_s3, %s256_s17 }
  0x12   : > { %s148_s26 = scalar_lea.vmem (!%p131_p9), [#allocation2], %s247_s27  ;;  %s193_s29 = sshll.u32 (!%p131_p9), %s189_s25, 4  ;;  %s194_s29 = int_to_ptr.hbm [resolvable:$true] %s193_s29 }
  0x13   : > { %v167_v0 = vld [vmem:[%s476_s2] sm:$0x3]  ;;  %v159_v3 = vld [vmem:[%s475_s1 + $0x8] sm:$0xff]  ;;  %s191_s28 = sshll.u32 %s148_s26, 4  ;;  %s178_s16 = scalar_lea.sflag [#allocation3], %s146_s24  ;;  %s192_s28 = int_to_ptr.vmem [resolvable:$true] %s191_s28 }
  0x14   : > { %v158_v1 = vld [vmem:[%s475_s1] sm:$0xff]  ;;  %v169_v5 = vperm.slane %v167_v0, 0  ;;  %v170_v7 = vperm.slane %v167_v0, 1  ;;  %s310_s30 = sshra.s32 %s194_s29, 4  ;;  %s316_s27 = scalar_lea.hbm %s477_s3, 32  ;;  %s311_s30 = int_to_ptr.hbm [resolvable:$true] %s310_s30 }
  0x15   : > { %v157_v2 = vld [vmem:[%s156_s7] ss:$2 sm:$0x3]  ;;  %s312_s4 = scalar_lea.hbm %s311_s30, 16  ;;  %p317_p13 = scmp.lt.s32.totalorder %s311_s30, %s477_s3 }
  0x16   : > { %v161_v4 = vperm.slane %v157_v2, 0  ;;  %v162_v6 = vperm.slane %v157_v2, 1  ;;  %p313_p10 = scmp.ne.s32.totalorder %s311_s30, %s312_s4  ;;  %p318_p0 = scmp.lt.s32.totalorder %s316_s27, %s312_s4 }
  0x18   : > { %v165_v8 = vadd.f32 %v161_v4, %v158_v1  ;;  %v166_v9 = vadd.f32 %v162_v6, %v159_v3  ;;  %p314_p11 = pnand %p313_p10, %p418_p5  ;;  %p319_p1 = por %p318_p0, %p317_p13 }
  0x1a   : > { %v173_v10 = vadd.f32 %v169_v5, %v165_v8  ;;  %v174_v11 = vadd.f32 %v170_v7, %v166_v9  ;;  %p315_p12 = pneg %p314_p11 }
  0x1c   : > { %175 = vst [vmem:[%s148_s26] sm:$0xff] %v173_v10  ;;  %p320_p2 = pnand %p319_p1, %p315_p12 }
  0x1d   : > { %176 = vst [vmem:[%s148_s26 + $0x8] sm:$0xff] %v174_v11 }
  0x1e   : > { %323 = shalt.err (!%p320_p2)
}
  0x1f   : > { %257 = dma.vmem_to_hbm [thread:$0]  (%p418_p5), %s192_s28, 256, %s194_s29, %s178_s16  }
  0x20 PF: > { %p263_p3 = scmp.ge.s32.totalorder %s358_s15, 2  ;;  %s205_s24 = sand.u32 1, %s346_s12  }
  0x21   : > { %s206_s9 = scalar_lea.sflag [#allocation3], %s205_s24 }
  0x22   : > { %p260_p4 = pnand %p263_p3, %p422_p6 }
  0x24   : > { %p261_p7 = pneg %p260_p4 }
  0x26   : > { %341 = dma.done.wait (%p261_p7), %s206_s9, 256  }
  0x27   : > { %343 = vsyncadd (%p261_p7), %s206_s9, 4294967040  ;;  %p13_p8 = scmp.ge.s32.totalorder %s405_s18, 4   ;;  %s480_s12 = smov %s350_s13 }
  0x28   : > { %s481_s13 = smov %s354_s14  ;;  %s482_s14 = smov %s416_s21 }
  0x29   : > { %s483_s15 = smov %s405_s18  ;;  %15 = sbr.rel (!%p13_p8) target bundleno = 3 (0x3), region = 65 }
  0x2e   :  { %212 = vsyncpa [#allocation3], 1 }
  0x2f   :  { %214 = vsyncpa [#allocation3 + $0x1], 1 }

</bundles_post_ra>
